<compile_context>
chip_gen: v6e
topology: v6e:2x2x1
jax: 0.10.0
libtpu: 0.0.40
codegen_flags: <defaults>
</compile_context>

<pallas_src>
import functools
import math

import jax
import jax.numpy as jnp
import numpy as np
from jax import lax
from jax.experimental import pallas as pl
from jax.experimental.pallas import tpu as pltpu

_NEG_INF = -1.0e30   # finite sentinel: exp underflows to 0, no NaN special-casing
_POS_BIG = 1.0e30    # lse sentinel for fully-masked rows: exp(s - _POS_BIG) -> 0


def _round_up(x, m):
    return ((x + m - 1) // m) * m


def _choose_tile(dim, block, align):
    """Tile size and padded length.  Never falls back to a giant full-dim tile:
    if dim > block we tile with `block` (rounded to `align`) and pad the array."""
    if dim <= block:
        t = _round_up(dim, 8)          # single full-dim block, sublane-aligned
        return t, t
    t = _round_up(block, align)
    return t, _round_up(dim, t)


@functools.lru_cache(maxsize=None)
def _default_vmem_limit():
    # ~3/4 of physical VMEM (128 MiB v5e/v6e, 64 MiB v7x); the 32 MiB scoped
    # default forces needlessly small blocks on the 128 MiB parts.
    cap = 64 * 1024 * 1024
    try:
        info = pltpu.get_tpu_info()
        cap = int(getattr(info, "vmem_capacity_bytes", cap) or cap)
    except Exception:
        pass
    return min(int(cap * 3 // 4), 100 * 1024 * 1024)


# ---------------------------------------------------------------------------
# Kernel A: Lq-tiled, full Lk resident, returns (out, attn) -- module semantics.
# ---------------------------------------------------------------------------
def _attn_kernel(*refs, has_mask, inv_temp, lk_valid, mask_pad_cols):
    if has_mask:
        q_ref, k_ref, v_ref, mask_ref, out_ref, attn_ref = refs
    else:
        q_ref, k_ref, v_ref, out_ref, attn_ref = refs
        mask_ref = None

    q = q_ref[0] * inv_temp              # (tq, Dk), input dtype; scale folded into q
    k = k_ref[0]                         # (Lk_pad, Dk)
    v = v_ref[0]                         # (Lk_pad, Dv)

    # scores = q @ k^T (contract last dims; no transposed copy of k), f32 on MXU.
    s = lax.dot_general(q, k, (((1,), (1,)), ((), ())),
                        preferred_element_type=jnp.float32)      # (tq, Lk_pad)

    masked = None
    if has_mask:
        masked = mask_ref[0] != 0        # (tq|1, Lk_pad), broadcasts against s
    elif mask_pad_cols:
        masked = lax.broadcasted_iota(jnp.int32, s.shape, 1) >= lk_valid
    if masked is not None:
        s = jnp.where(masked, _NEG_INF, s)

    m = jnp.max(s, axis=-1, keepdims=True)
    e = jnp.exp(s - m)
    if masked is not None:
        e = jnp.where(masked, 0.0, e)    # exact zeros for masked probabilities
    denom = jnp.sum(e, axis=-1, keepdims=True)
    inv_denom = jnp.where(denom > 0.0, pl.reciprocal(denom, approx=True), 0.0)
    attn = e * inv_denom                 # (tq, Lk_pad) f32; fully-masked row -> 0

    out = jnp.dot(attn.astype(v.dtype), v, preferred_element_type=jnp.float32)
    attn_ref[0] = attn.astype(attn_ref.dtype)
    out_ref[0] = out.astype(out_ref.dtype)


# ---------------------------------------------------------------------------
# Kernel B: flash-style online softmax; writes out and log-sum-exp.
# ---------------------------------------------------------------------------
def _flash_kernel(*refs, has_mask, inv_temp, lk_valid, tk, mask_pad_cols):
    if has_mask:
        (q_ref, k_ref, v_ref, mask_ref, out_ref, lse_ref,
         q_sc, m_sc, l_sc, acc_sc) = refs
    else:
        q_ref, k_ref, v_ref, out_ref, lse_ref, q_sc, m_sc, l_sc, acc_sc = refs
        mask_ref = None

    kj = pl.program_id(2)

    @pl.when(kj == 0)
    def _init():
        q_sc[...] = q_ref[0] * inv_temp          # scale q once per query tile
        m_sc[...] = jnp.full(m_sc.shape, _NEG_INF, dtype=m_sc.dtype)
        l_sc[...] = jnp.zeros(l_sc.shape, dtype=l_sc.dtype)
        acc_sc[...] = jnp.zeros(acc_sc.shape, dtype=acc_sc.dtype)

    k = k_ref[0]                                 # (tk, Dk)
    v = v_ref[0]                                 # (tk, Dv)
    s = lax.dot_general(q_sc[...], k, (((1,), (1,)), ((), ())),
                        preferred_element_type=jnp.float32)      # (tq, tk)

    masked = None
    if has_mask:
        masked = mask_ref[0] != 0
    elif mask_pad_cols:
        col = kj * tk + lax.broadcasted_iota(jnp.int32, s.shape, 1)
        masked = col >= lk_valid
    if masked is not None:
        s = jnp.where(masked, _NEG_INF, s)

    m_prev = m_sc[...]
    m_new = jnp.maximum(m_prev, jnp.max(s, axis=-1, keepdims=True))
    alpha = jnp.exp(m_prev - m_new)
    p = jnp.exp(s - m_new)
    if masked is not None:
        p = jnp.where(masked, 0.0, p)            # robust even for fully-masked tiles

    l_sc[...] = alpha * l_sc[...] + jnp.sum(p, axis=-1, keepdims=True)
    acc_sc[...] = alpha * acc_sc[...] + jnp.dot(
        p.astype(v.dtype), v, preferred_element_type=jnp.float32)
    m_sc[...] = m_new

    @pl.when(kj == pl.num_programs(2) - 1)
    def _finalize():
        l = l_sc[...]
        inv_l = jnp.where(l > 0.0, pl.reciprocal(l, approx=True), 0.0)
        out_ref[0] = (acc_sc[...] * inv_l).astype(out_ref.dtype)
        # lse = m + log(l); fully-masked rows get +BIG so exp(s - lse) -> 0 in pass 2.
        lse_ref[0] = jnp.where(l > 0.0, m_sc[...] + jnp.log(l),
                               _POS_BIG).astype(lse_ref.dtype)


# ---------------------------------------------------------------------------
# Kernel C: attn tile materialization from the lse (pass 2 of two-pass path).
# ---------------------------------------------------------------------------
def _attn_tile_kernel(*refs, has_mask, inv_temp):
    if has_mask:
        q_ref, k_ref, lse_ref, mask_ref, attn_ref = refs
    else:
        q_ref, k_ref, lse_ref, attn_ref = refs
        mask_ref = None

    q = q_ref[0] * inv_temp
    s = lax.dot_general(q, k_ref[0], (((1,), (1,)), ((), ())),
                        preferred_element_type=jnp.float32)      # (tq, tk)
    masked = None
    if has_mask:
        masked = mask_ref[0] != 0
        s = jnp.where(masked, _NEG_INF, s)
    p = jnp.exp(s - lse_ref[0])                  # lse is (tq, 1); broadcasts
    if masked is not None:
        p = jnp.where(masked, 0.0, p)
    attn_ref[0] = p.astype(attn_ref.dtype)       # padded cols are sliced off outside


# ---------------------------------------------------------------------------
# Wrapper
# ---------------------------------------------------------------------------
def scaled_dot_product_attention(q, k, v, mask=None, *, temperature=1.0,
                                 return_attn=True, block_q=256, block_k=512,
                                 vmem_limit_bytes=None, attn_full_kv_max_lk=4096):
    """Matches ScaledDotProductAttention.forward.

    return_attn=True  -> (output, attn)   (module semantics)
    return_attn=False -> output only, via the flash (no attn writeback) kernel.
    `mask` may be any shape broadcastable to (B, Lq, Lk); truthy entries are masked.
    Fully-masked rows yield 0 (not NaN as literal softmax over all -inf would).
    """
    B, Lq, Dk = q.shape
    _, Lk, _ = k.shape
    Dv = v.shape[-1]
    inv_temp = float(1.0 / temperature)
    if vmem_limit_bytes is None:
        vmem_limit_bytes = _default_vmem_limit()

    # Residency guard: keep full K/V resident only for moderate Lk (esp. v7x 64 MiB).
    use_full_kv = return_attn and Lk <= attn_full_kv_max_lk

    tq, Lq_pad = _choose_tile(Lq, block_q, 8)
    if use_full_kv:
        tk = Lk_pad = _round_up(Lk, 8)
    else:
        tk, Lk_pad = _choose_tile(Lk, block_k, 128)

    q_p = jnp.pad(q, ((0, 0), (0, Lq_pad - Lq), (0, 0))) if Lq_pad != Lq else q
    k_p = jnp.pad(k, ((0, 0), (0, Lk_pad - Lk), (0, 0))) if Lk_pad != Lk else k
    v_p = jnp.pad(v, ((0, 0), (0, Lk_pad - Lk), (0, 0))) if Lk_pad != Lk else v

    has_mask = mask is not None
    key_only = False
    mask_p = None
    if has_mask:
        m = jnp.asarray(mask)
        if m.ndim == 2:
            m = m[None]
        key_only = (m.shape[-2] == 1)            # (B?, 1, Lk): key-padding mask
        rows = 1 if key_only else Lq
        m = jnp.broadcast_to(m != 0, (B, rows, Lk)).astype(jnp.int8)
        pad_r = 0 if key_only else (Lq_pad - Lq)
        if pad_r or Lk_pad != Lk:                # padded keys/rows are "masked"
            m = jnp.pad(m, ((0, 0), (0, pad_r), (0, Lk_pad - Lk)), constant_values=1)
        mask_p = m
    mask_pad_cols = (Lk_pad > Lk) and not has_mask

    itemsize = jnp.dtype(q.dtype).itemsize
    flops = int(2 * B * Lq * Lk * (Dk + Dv))
    transc = int(B * Lq * Lk)
    io_bytes = int((q.size + k.size + v.size + B * Lq * Dv) * itemsize)
    if has_mask:
        io_bytes += int(mask_p.size)

    cp2 = pltpu.CompilerParams(dimension_semantics=("parallel", "parallel"),
                               vmem_limit_bytes=vmem_limit_bytes)
    cp3 = pltpu.CompilerParams(dimension_semantics=("parallel", "parallel", "arbitrary"),
                               vmem_limit_bytes=vmem_limit_bytes)
    cp3p = pltpu.CompilerParams(dimension_semantics=("parallel", "parallel", "parallel"),
                                vmem_limit_bytes=vmem_limit_bytes)

    # ---------------- Kernel A path: full-Lk K/V, (out, attn) in one pass --------
    if use_full_kv:
        kern = functools.partial(_attn_kernel, has_mask=has_mask, inv_temp=inv_temp,
                                 lk_valid=Lk, mask_pad_cols=mask_pad_cols)

        def _call(single_buffer_kv):
            # K/V block index only changes on the slow batch axis -> single buffer
            # saves Lk*(Dk+Dv)*itemsize of VMEM at no re-DMA cost.
            kv_kw = dict(pipeline_mode=pl.Buffered(1)) if single_buffer_kv else {}
            in_specs = [
                pl.BlockSpec((1, tq, Dk), lambda b, qi: (b, qi, 0)),
                pl.BlockSpec((1, Lk_pad, Dk), lambda b, qi: (b, 0, 0), **kv_kw),
                pl.BlockSpec((1, Lk_pad, Dv), lambda b, qi: (b, 0, 0), **kv_kw),
            ]
            inputs = [q_p, k_p, v_p]
            if has_mask:
                if key_only:
                    in_specs.append(pl.BlockSpec((1, 1, Lk_pad), lambda b, qi: (b, 0, 0)))
                else:
                    in_specs.append(pl.BlockSpec((1, tq, Lk_pad), lambda b, qi: (b, qi, 0)))
                inputs.append(mask_p)
            out_specs = [
                pl.BlockSpec((1, tq, Dv), lambda b, qi: (b, qi, 0)),
                pl.BlockSpec((1, tq, Lk_pad), lambda b, qi: (b, qi, 0)),
            ]
            out_shapes = (jax.ShapeDtypeStruct((B, Lq_pad, Dv), q.dtype),
                          jax.ShapeDtypeStruct((B, Lq_pad, Lk_pad), q.dtype))
            cost = pl.CostEstimate(flops=flops, transcendentals=transc,
                                   bytes_accessed=int(io_bytes + B * Lq * Lk * itemsize))
            return pl.pallas_call(
                kern, out_shape=out_shapes,
                grid_spec=pltpu.PrefetchScalarGridSpec(
                    num_scalar_prefetch=0, grid=(B, Lq_pad // tq),
                    in_specs=in_specs, out_specs=out_specs),
                compiler_params=cp2, cost_estimate=cost)(*inputs)

        try:
            out_p, attn_p = _call(True)
        except Exception:   # pl.Buffered(1)/pipeline_mode unsupported -> default buffering
            out_p, attn_p = _call(False)
        return out_p[:, :Lq, :], attn_p[:, :Lq, :Lk]

    # ---------------- Flash path (pass 1): out + lse, no attn writeback ----------
    kern_b = functools.partial(_flash_kernel, has_mask=has_mask, inv_temp=inv_temp,
                               lk_valid=Lk, tk=tk, mask_pad_cols=mask_pad_cols)
    in_specs = [
        pl.BlockSpec((1, tq, Dk), lambda b, qi, kj: (b, qi, 0)),
        pl.BlockSpec((1, tk, Dk), lambda b, qi, kj: (b, kj, 0)),
        pl.BlockSpec((1, tk, Dv), lambda b, qi, kj: (b, kj, 0)),
    ]
    inputs = [q_p, k_p, v_p]
    if has_mask:
        if key_only:
            in_specs.append(pl.BlockSpec((1, 1, tk), lambda b, qi, kj: (b, 0, kj)))
        else:
            in_specs.append(pl.BlockSpec((1, tq, tk), lambda b, qi, kj: (b, qi, kj)))
        inputs.append(mask_p)
    out_specs = [pl.BlockSpec((1, tq, Dv), lambda b, qi, kj: (b, qi, 0)),
                 pl.BlockSpec((1, tq, 1), lambda b, qi, kj: (b, qi, 0))]
    out_shapes = (jax.ShapeDtypeStruct((B, Lq_pad, Dv), q.dtype),
                  jax.ShapeDtypeStruct((B, Lq_pad, 1), jnp.float32))
    cost = pl.CostEstimate(flops=flops, transcendentals=transc, bytes_accessed=io_bytes)
    out_p, lse_p = pl.pallas_call(
        kern_b, out_shape=out_shapes,
        grid_spec=pltpu.PrefetchScalarGridSpec(
            num_scalar_prefetch=0, grid=(B, Lq_pad // tq, Lk_pad // tk),
            in_specs=in_specs, out_specs=out_specs,
            scratch_shapes=[pltpu.VMEM((tq, Dk), q.dtype),     # scaled q
                            pltpu.VMEM((tq, 1), jnp.float32),  # running max m
                            pltpu.VMEM((tq, 1), jnp.float32),  # running denom l
                            pltpu.VMEM((tq, Dv), jnp.float32)  # output accumulator
                            ]),
        compiler_params=cp3, cost_estimate=cost)(*inputs)

    if not return_attn:
        return out_p[:, :Lq, :]

    # ---------------- Two-pass attn path (pass 2): attn = exp(s - lse), tiled ----
    kern_c = functools.partial(_attn_tile_kernel, has_mask=has_mask, inv_temp=inv_temp)
    in_specs_c = [
        pl.BlockSpec((1, tq, Dk), lambda b, qi, kj: (b, qi, 0)),
        pl.BlockSpec((1, tk, Dk), lambda b, qi, kj: (b, kj, 0)),
        pl.BlockSpec((1, tq, 1), lambda b, qi, kj: (b, qi, 0)),
    ]
    inputs_c = [q_p, k_p, lse_p]
    if has_mask:
        if key_only:
            in_specs_c.append(pl.BlockSpec((1, 1, tk), lambda b, qi, kj: (b, 0, kj)))
        else:
            in_specs_c.append(pl.BlockSpec((1, tq, tk), lambda b, qi, kj: (b, qi, kj)))
        inputs_c.append(mask_p)
    cost_c = pl.CostEstimate(flops=int(2 * B * Lq * Lk * Dk), transcendentals=transc,
                             bytes_accessed=int(io_bytes + B * Lq * Lk * itemsize))
    attn_p = pl.pallas_call(
        kern_c,
        out_shape=jax.ShapeDtypeStruct((B, Lq_pad, Lk_pad), q.dtype),
        grid_spec=pltpu.PrefetchScalarGridSpec(
            num_scalar_prefetch=0, grid=(B, Lq_pad // tq, Lk_pad // tk),
            in_specs=in_specs_c,
            out_specs=pl.BlockSpec((1, tq, tk), lambda b, qi, kj: (b, qi, kj))),
        compiler_params=cp3p, cost_estimate=cost_c)(*inputs_c)

    return out_p[:, :Lq, :], attn_p[:, :Lq, :Lk]


# ---------------------------------------------------------------------------
# Reference + self-test
# ---------------------------------------------------------------------------
def _reference(q, k, v, mask, temperature):
    s = jnp.einsum("bqd,bkd->bqk", q, k) / temperature
    if mask is not None:
        s = jnp.where(jnp.asarray(mask) != 0, -jnp.inf, s)
    attn = jax.nn.softmax(s, axis=2)
    out = jnp.einsum("bqk,bkd->bqd", attn, v)
    return out, attn


if __name__ == "__main__":
    RTOL = ATOL = 2e-3   # pl.reciprocal(approx=True) is an EUP approximation

    B, Lq, Lk, Dk, Dv = 2, 8, 8, 32, 32
    temperature = float(math.sqrt(Dk))   # standard choice from the module __init__

    key = jax.random.PRNGKey(0)
    kq, kk, kv = jax.random.split(key, 3)
    q = jax.random.normal(kq, (B, Lq, Dk), dtype=jnp.float32)
    k = jax.random.normal(kk, (B, Lk, Dk), dtype=jnp.float32)
    v = jax.random.normal(kv, (B, Lk, Dv), dtype=jnp.float32)

    # Causal mask (no fully-masked rows, so the -inf reference has no NaNs).
    causal = (jnp.arange(Lk)[None, :] > jnp.arange(Lq)[:, None]).astype(jnp.int32)
    causal_mask = jnp.broadcast_to(causal, (B, Lq, Lk))
    # Key-padding mask in its natural broadcastable shape (B, 1, Lk).
    key_pad_mask = jnp.broadcast_to(
        (jnp.arange(Lk)[None, None, :] >= Lk - 2).astype(jnp.int32), (B, 1, Lk))

    ref_out_c, ref_attn_c = _reference(q, k, v, causal_mask, temperature)
    ref_out_n, ref_attn_n = _reference(q, k, v, None, temperature)
    ref_out_p, ref_attn_p = _reference(q, k, v, key_pad_mask, temperature)

    def check(got, want):
        np.testing.assert_allclose(np.asarray(jax.block_until_ready(got)),
                                   np.asarray(want), rtol=RTOL, atol=ATOL)

    # 1) default (full-KV) path, per-query causal mask
    out, attn = scaled_dot_product_attention(q, k, v, causal_mask, temperature=temperature)
    check(out, ref_out_c); check(attn, ref_attn_c)

    # 2) default path, no mask (no mask tensor shipped at all)
    out, attn = scaled_dot_product_attention(q, k, v, None, temperature=temperature)
    check(out, ref_out_n); check(attn, ref_attn_n)

    # 3) default path, broadcast key-padding mask (never expanded to (B, Lq, Lk))
    out, attn = scaled_dot_product_attention(q, k, v, key_pad_mask, temperature=temperature)
    check(out, ref_out_p); check(attn, ref_attn_p)

    # 4) flash path (no attention-matrix writeback), causal mask
    out = scaled_dot_product_attention(q, k, v, causal_mask, temperature=temperature,
                                       return_attn=False)
    check(out, ref_out_c)

    # 5) two-pass long-Lk attn path (force it by setting the residency threshold to 0)
    out, attn = scaled_dot_product_attention(q, k, v, causal_mask, temperature=temperature,
                                             attn_full_kv_max_lk=0)
    check(out, ref_out_c); check(attn, ref_attn_c)

    # 6) ragged (non-tile-multiple) lengths exercise padding + in-kernel tail masking
    Lq2, Lk2, Dv2 = 10, 12, 16
    q2 = jax.random.normal(kq, (B, Lq2, Dk), dtype=jnp.float32)
    k2 = jax.random.normal(kk, (B, Lk2, Dk), dtype=jnp.float32)
    v2 = jax.random.normal(kv, (B, Lk2, Dv2), dtype=jnp.float32)
    ref_out2, ref_attn2 = _reference(q2, k2, v2, None, temperature)
    out2, attn2 = scaled_dot_product_attention(q2, k2, v2, None, temperature=temperature)
    check(out2, ref_out2); check(attn2, ref_attn2)
    out2f = scaled_dot_product_attention(q2, k2, v2, None, temperature=temperature,
                                         return_attn=False)
    check(out2f, ref_out2)

    print("KERNEL_OK")
</pallas_src>

<mosaic_0001>
module attributes {stable_mosaic.version = 11 : i64} {
  func.func @_attn_kernel(%arg0: i32, %arg1: i32, %arg2: memref<1x8x32xf32, #tpu.memory_space<vmem>>, %arg3: memref<1x8x32xf32, #tpu.memory_space<vmem>>, %arg4: memref<1x8x32xf32, #tpu.memory_space<vmem>>, %arg5: memref<1x8x8xi8, #tpu.memory_space<vmem>>, %arg6: memref<1x8x32xf32, #tpu.memory_space<vmem>>, %arg7: memref<1x8x8xf32, #tpu.memory_space<vmem>>) attributes {dimension_semantics = [#tpu.dimension_semantics<parallel>, #tpu.dimension_semantics<parallel>], iteration_bounds = array<i64: 2, 1>, scalar_prefetch = 0 : i64, scratch_operands = 0 : i64, tpu.core_type = #tpu.core_type<tc>, window_params = [{transform_indices = @transform_0, window_bounds = array<i64: 1, 8, 32>}, {pipeline_mode = #tpu.pipeline_mode<synchronous>, transform_indices = @transform_1, window_bounds = array<i64: 1, 8, 32>}, {pipeline_mode = #tpu.pipeline_mode<synchronous>, transform_indices = @transform_2, window_bounds = array<i64: 1, 8, 32>}, {transform_indices = @transform_3, window_bounds = array<i64: 1, 8, 8>}, {transform_indices = @transform_4, window_bounds = array<i64: 1, 8, 32>}, {transform_indices = @transform_5, window_bounds = array<i64: 1, 8, 8>}]} {
    %c0 = arith.constant 0 : index
    %c0_0 = arith.constant 0 : index
    %c0_1 = arith.constant 0 : index
    %0 = vector.load %arg2[%c0, %c0_0, %c0_1] : memref<1x8x32xf32, #tpu.memory_space<vmem>>, vector<1x8x32xf32>
    %1 = vector.shape_cast %0 : vector<1x8x32xf32> to vector<8x32xf32>
    %cst = arith.constant 0.176776692 : f32
    %2 = vector.broadcast %cst : f32 to vector<8x32xf32>
    %3 = arith.mulf %1, %2 : vector<8x32xf32>
    %c0_2 = arith.constant 0 : index
    %c0_3 = arith.constant 0 : index
    %c0_4 = arith.constant 0 : index
    %4 = vector.load %arg3[%c0_2, %c0_3, %c0_4] : memref<1x8x32xf32, #tpu.memory_space<vmem>>, vector<1x8x32xf32>
    %5 = vector.shape_cast %4 : vector<1x8x32xf32> to vector<8x32xf32>
    %c0_5 = arith.constant 0 : index
    %c0_6 = arith.constant 0 : index
    %c0_7 = arith.constant 0 : index
    %6 = vector.load %arg4[%c0_5, %c0_6, %c0_7] : memref<1x8x32xf32, #tpu.memory_space<vmem>>, vector<1x8x32xf32>
    %7 = vector.shape_cast %6 : vector<1x8x32xf32> to vector<8x32xf32>
    %cst_8 = arith.constant dense<0.000000e+00> : vector<8x8xf32>
    %8 = tpu.matmul %3, %5, %cst_8 {dimension_numbers = #tpu.dot_dimension_numbers<[1], [1], [0], [0], [0, 0, 1, 0], [], []>} : vector<8x32xf32>, vector<8x32xf32>, vector<8x8xf32> -> vector<8x8xf32>
    %c0_9 = arith.constant 0 : index
    %c0_10 = arith.constant 0 : index
    %c0_11 = arith.constant 0 : index
    %9 = vector.load %arg5[%c0_9, %c0_10, %c0_11] : memref<1x8x8xi8, #tpu.memory_space<vmem>>, vector<1x8x8xi8>
    %10 = vector.shape_cast %9 : vector<1x8x8xi8> to vector<8x8xi8>
    %c0_i8 = arith.constant 0 : i8
    %11 = vector.broadcast %c0_i8 : i8 to vector<8x8xi8>
    %12 = arith.cmpi ne, %10, %11 : vector<8x8xi8>
    %cst_12 = arith.constant -1.000000e+30 : f32
    %13 = vector.broadcast %cst_12 : f32 to vector<8x8xf32>
    %14 = arith.select %12, %13, %8 : vector<8x8xi1>, vector<8x8xf32>
    %cst_13 = arith.constant dense<0xFF800000> : vector<8xf32>
    %15 = vector.multi_reduction <maximumf>, %14, %cst_13 [1] : vector<8x8xf32> to vector<8xf32>
    %16 = vector.shape_cast %15 : vector<8xf32> to vector<8x1xf32>
    %17 = vector.broadcast %16 : vector<8x1xf32> to vector<8x8xf32>
    %18 = arith.subf %14, %17 : vector<8x8xf32>
    %19 = math.exp %18 : vector<8x8xf32>
    %cst_14 = arith.constant 0.000000e+00 : f32
    %20 = vector.broadcast %cst_14 : f32 to vector<8x8xf32>
    %21 = arith.select %12, %20, %19 : vector<8x8xi1>, vector<8x8xf32>
    %cst_15 = arith.constant dense<0.000000e+00> : vector<8xf32>
    %22 = vector.multi_reduction <add>, %21, %cst_15 [1] : vector<8x8xf32> to vector<8xf32>
    %23 = vector.shape_cast %22 : vector<8xf32> to vector<8x1xf32>
    %cst_16 = arith.constant 0.000000e+00 : f32
    %24 = vector.broadcast %cst_16 : f32 to vector<8x1xf32>
    %25 = arith.cmpf ogt, %23, %24 : vector<8x1xf32>
    %26 = tpu.reciprocal %23 {approx = true} : vector<8x1xf32> -> vector<8x1xf32>
    %cst_17 = arith.constant 0.000000e+00 : f32
    %27 = vector.broadcast %cst_17 : f32 to vector<8x1xf32>
    %28 = arith.select %25, %26, %27 : vector<8x1xi1>, vector<8x1xf32>
    %29 = vector.broadcast %28 : vector<8x1xf32> to vector<8x8xf32>
    %30 = arith.mulf %21, %29 : vector<8x8xf32>
    %cst_18 = arith.constant dense<0.000000e+00> : vector<8x32xf32>
    %31 = tpu.matmul %30, %7, %cst_18 {dimension_numbers = #tpu.dot_dimension_numbers<[1], [0], [0], [1], [0, 0, 1, 1], [], []>} : vector<8x8xf32>, vector<8x32xf32>, vector<8x32xf32> -> vector<8x32xf32>
    %c0_19 = arith.constant 0 : index
    %c0_20 = arith.constant 0 : index
    %c0_21 = arith.constant 0 : index
    %32 = vector.load %arg7[%c0_19, %c0_20, %c0_21] : memref<1x8x8xf32, #tpu.memory_space<vmem>>, vector<1x8x8xf32>
    %33 = vector.shape_cast %32 : vector<1x8x8xf32> to vector<8x8xf32>
    %34 = vector.shape_cast %30 : vector<8x8xf32> to vector<1x8x8xf32>
    tpu.vector_store %arg7[%c0_19, %c0_20, %c0_21], %34 {strides = array<i32>} : memref<1x8x8xf32, #tpu.memory_space<vmem>>, vector<1x8x8xf32>,
    %c0_22 = arith.constant 0 : index
    %c0_23 = arith.constant 0 : index
    %c0_24 = arith.constant 0 : index
    %35 = vector.load %arg6[%c0_22, %c0_23, %c0_24] : memref<1x8x32xf32, #tpu.memory_space<vmem>>, vector<1x8x32xf32>
    %36 = vector.shape_cast %35 : vector<1x8x32xf32> to vector<8x32xf32>
    %37 = vector.shape_cast %31 : vector<8x32xf32> to vector<1x8x32xf32>
    tpu.vector_store %arg6[%c0_22, %c0_23, %c0_24], %37 {strides = array<i32>} : memref<1x8x32xf32, #tpu.memory_space<vmem>>, vector<1x8x32xf32>,
    return
  }
  func.func @transform_0(%arg0: i32, %arg1: i32) -> (i32, i32, i32) {
    %c0_i32 = arith.constant 0 : i32
    %c0_i32_0 = arith.constant 0 : i32
    return %arg0, %arg1, %c0_i32 : i32, i32, i32
  }
  func.func @transform_1(%arg0: i32, %arg1: i32) -> (i32, i32, i32) {
    %c0_i32 = arith.constant 0 : i32
    %c0_i32_0 = arith.constant 0 : i32
    %c0_i32_1 = arith.constant 0 : i32
    return %arg0, %c0_i32, %c0_i32_0 : i32, i32, i32
  }
  func.func @transform_2(%arg0: i32, %arg1: i32) -> (i32, i32, i32) {
    %c0_i32 = arith.constant 0 : i32
    %c0_i32_0 = arith.constant 0 : i32
    %c0_i32_1 = arith.constant 0 : i32
    return %arg0, %c0_i32, %c0_i32_0 : i32, i32, i32
  }
  func.func @transform_3(%arg0: i32, %arg1: i32) -> (i32, i32, i32) {
    %c0_i32 = arith.constant 0 : i32
    %c0_i32_0 = arith.constant 0 : i32
    return %arg0, %arg1, %c0_i32 : i32, i32, i32
  }
  func.func @transform_4(%arg0: i32, %arg1: i32) -> (i32, i32, i32) {
    %c0_i32 = arith.constant 0 : i32
    %c0_i32_0 = arith.constant 0 : i32
    return %arg0, %arg1, %c0_i32 : i32, i32, i32
  }
  func.func @transform_5(%arg0: i32, %arg1: i32) -> (i32, i32, i32) {
    %c0_i32 = arith.constant 0 : i32
    %c0_i32_0 = arith.constant 0 : i32
    return %arg0, %arg1, %c0_i32 : i32, i32, i32
  }
}

module attributes {stable_mosaic.version = 11 : i64} {
  func.func @_attn_kernel(%arg0: i32, %arg1: i32, %arg2: memref<1x8x32xf32, #tpu.memory_space<vmem>>, %arg3: memref<1x8x32xf32, #tpu.memory_space<vmem>>, %arg4: memref<1x8x32xf32, #tpu.memory_space<vmem>>, %arg5: memref<1x8x8xi8, #tpu.memory_space<vmem>>, %arg6: memref<1x8x32xf32, #tpu.memory_space<vmem>>, %arg7: memref<1x8x8xf32, #tpu.memory_space<vmem>>) attributes {dimension_semantics = [#tpu.dimension_semantics<parallel>, #tpu.dimension_semantics<parallel>], iteration_bounds = array<i64: 2, 1>, scalar_prefetch = 0 : i64, scratch_operands = 0 : i64, tpu.core_type = #tpu.core_type<tc>, window_params = [{transform_indices = @transform_0, window_bounds = array<i64: 1, 8, 32>}, {transform_indices = @transform_1, window_bounds = array<i64: 1, 8, 32>}, {transform_indices = @transform_2, window_bounds = array<i64: 1, 8, 32>}, {transform_indices = @transform_3, window_bounds = array<i64: 1, 8, 8>}, {transform_indices = @transform_4, window_bounds = array<i64: 1, 8, 32>}, {transform_indices = @transform_5, window_bounds = array<i64: 1, 8, 8>}]} {
    %c0 = arith.constant 0 : index
    %c0_0 = arith.constant 0 : index
    %c0_1 = arith.constant 0 : index
    %0 = vector.load %arg2[%c0, %c0_0, %c0_1] : memref<1x8x32xf32, #tpu.memory_space<vmem>>, vector<1x8x32xf32>
    %1 = vector.shape_cast %0 : vector<1x8x32xf32> to vector<8x32xf32>
    %cst = arith.constant 0.176776692 : f32
    %2 = vector.broadcast %cst : f32 to vector<8x32xf32>
    %3 = arith.mulf %1, %2 : vector<8x32xf32>
    %c0_2 = arith.constant 0 : index
    %c0_3 = arith.constant 0 : index
    %c0_4 = arith.constant 0 : index
    %4 = vector.load %arg3[%c0_2, %c0_3, %c0_4] : memref<1x8x32xf32, #tpu.memory_space<vmem>>, vector<1x8x32xf32>
    %5 = vector.shape_cast %4 : vector<1x8x32xf32> to vector<8x32xf32>
    %c0_5 = arith.constant 0 : index
    %c0_6 = arith.constant 0 : index
    %c0_7 = arith.constant 0 : index
    %6 = vector.load %arg4[%c0_5, %c0_6, %c0_7] : memref<1x8x32xf32, #tpu.memory_space<vmem>>, vector<1x8x32xf32>
    %7 = vector.shape_cast %6 : vector<1x8x32xf32> to vector<8x32xf32>
    %cst_8 = arith.constant dense<0.000000e+00> : vector<8x8xf32>
    %8 = tpu.matmul %3, %5, %cst_8 {dimension_numbers = #tpu.dot_dimension_numbers<[1], [1], [0], [0], [0, 0, 1, 0], [], []>} : vector<8x32xf32>, vector<8x32xf32>, vector<8x8xf32> -> vector<8x8xf32>
    %c0_9 = arith.constant 0 : index
    %c0_10 = arith.constant 0 : index
    %c0_11 = arith.constant 0 : index
    %9 = vector.load %arg5[%c0_9, %c0_10, %c0_11] : memref<1x8x8xi8, #tpu.memory_space<vmem>>, vector<1x8x8xi8>
    %10 = vector.shape_cast %9 : vector<1x8x8xi8> to vector<8x8xi8>
    %c0_i8 = arith.constant 0 : i8
    %11 = vector.broadcast %c0_i8 : i8 to vector<8x8xi8>
    %12 = arith.cmpi ne, %10, %11 : vector<8x8xi8>
    %cst_12 = arith.constant -1.000000e+30 : f32
    %13 = vector.broadcast %cst_12 : f32 to vector<8x8xf32>
    %14 = arith.select %12, %13, %8 : vector<8x8xi1>, vector<8x8xf32>
    %cst_13 = arith.constant dense<0xFF800000> : vector<8xf32>
    %15 = vector.multi_reduction <maximumf>, %14, %cst_13 [1] : vector<8x8xf32> to vector<8xf32>
    %16 = vector.shape_cast %15 : vector<8xf32> to vector<8x1xf32>
    %17 = vector.broadcast %16 : vector<8x1xf32> to vector<8x8xf32>
    %18 = arith.subf %14, %17 : vector<8x8xf32>
    %19 = math.exp %18 : vector<8x8xf32>
    %cst_14 = arith.constant 0.000000e+00 : f32
    %20 = vector.broadcast %cst_14 : f32 to vector<8x8xf32>
    %21 = arith.select %12, %20, %19 : vector<8x8xi1>, vector<8x8xf32>
    %cst_15 = arith.constant dense<0.000000e+00> : vector<8xf32>
    %22 = vector.multi_reduction <add>, %21, %cst_15 [1] : vector<8x8xf32> to vector<8xf32>
    %23 = vector.shape_cast %22 : vector<8xf32> to vector<8x1xf32>
    %cst_16 = arith.constant 0.000000e+00 : f32
    %24 = vector.broadcast %cst_16 : f32 to vector<8x1xf32>
    %25 = arith.cmpf ogt, %23, %24 : vector<8x1xf32>
    %26 = tpu.reciprocal %23 {approx = true} : vector<8x1xf32> -> vector<8x1xf32>
    %cst_17 = arith.constant 0.000000e+00 : f32
    %27 = vector.broadcast %cst_17 : f32 to vector<8x1xf32>
    %28 = arith.select %25, %26, %27 : vector<8x1xi1>, vector<8x1xf32>
    %29 = vector.broadcast %28 : vector<8x1xf32> to vector<8x8xf32>
    %30 = arith.mulf %21, %29 : vector<8x8xf32>
    %cst_18 = arith.constant dense<0.000000e+00> : vector<8x32xf32>
    %31 = tpu.matmul %30, %7, %cst_18 {dimension_numbers = #tpu.dot_dimension_numbers<[1], [0], [0], [1], [0, 0, 1, 1], [], []>} : vector<8x8xf32>, vector<8x32xf32>, vector<8x32xf32> -> vector<8x32xf32>
    %c0_19 = arith.constant 0 : index
    %c0_20 = arith.constant 0 : index
    %c0_21 = arith.constant 0 : index
    %32 = vector.load %arg7[%c0_19, %c0_20, %c0_21] : memref<1x8x8xf32, #tpu.memory_space<vmem>>, vector<1x8x8xf32>
    %33 = vector.shape_cast %32 : vector<1x8x8xf32> to vector<8x8xf32>
    %34 = vector.shape_cast %30 : vector<8x8xf32> to vector<1x8x8xf32>
    tpu.vector_store %arg7[%c0_19, %c0_20, %c0_21], %34 {strides = array<i32>} : memref<1x8x8xf32, #tpu.memory_space<vmem>>, vector<1x8x8xf32>,
    %c0_22 = arith.constant 0 : index
    %c0_23 = arith.constant 0 : index
    %c0_24 = arith.constant 0 : index
    %35 = vector.load %arg6[%c0_22, %c0_23, %c0_24] : memref<1x8x32xf32, #tpu.memory_space<vmem>>, vector<1x8x32xf32>
    %36 = vector.shape_cast %35 : vector<1x8x32xf32> to vector<8x32xf32>
    %37 = vector.shape_cast %31 : vector<8x32xf32> to vector<1x8x32xf32>
    tpu.vector_store %arg6[%c0_22, %c0_23, %c0_24], %37 {strides = array<i32>} : memref<1x8x32xf32, #tpu.memory_space<vmem>>, vector<1x8x32xf32>,
    return
  }
  func.func @transform_0(%arg0: i32, %arg1: i32) -> (i32, i32, i32) {
    %c0_i32 = arith.constant 0 : i32
    %c0_i32_0 = arith.constant 0 : i32
    return %arg0, %arg1, %c0_i32 : i32, i32, i32
  }
  func.func @transform_1(%arg0: i32, %arg1: i32) -> (i32, i32, i32) {
    %c0_i32 = arith.constant 0 : i32
    %c0_i32_0 = arith.constant 0 : i32
    %c0_i32_1 = arith.constant 0 : i32
    return %arg0, %c0_i32, %c0_i32_0 : i32, i32, i32
  }
  func.func @transform_2(%arg0: i32, %arg1: i32) -> (i32, i32, i32) {
    %c0_i32 = arith.constant 0 : i32
    %c0_i32_0 = arith.constant 0 : i32
    %c0_i32_1 = arith.constant 0 : i32
    return %arg0, %c0_i32, %c0_i32_0 : i32, i32, i32
  }
  func.func @transform_3(%arg0: i32, %arg1: i32) -> (i32, i32, i32) {
    %c0_i32 = arith.constant 0 : i32
    %c0_i32_0 = arith.constant 0 : i32
    return %arg0, %arg1, %c0_i32 : i32, i32, i32
  }
  func.func @transform_4(%arg0: i32, %arg1: i32) -> (i32, i32, i32) {
    %c0_i32 = arith.constant 0 : i32
    %c0_i32_0 = arith.constant 0 : i32
    return %arg0, %arg1, %c0_i32 : i32, i32, i32
  }
  func.func @transform_5(%arg0: i32, %arg1: i32) -> (i32, i32, i32) {
    %c0_i32 = arith.constant 0 : i32
    %c0_i32_0 = arith.constant 0 : i32
    return %arg0, %arg1, %c0_i32 : i32, i32, i32
  }
}

</mosaic_0001>

<bundles_post_ra>
// kernel: tpu_custom_call.1
= control target key start
LH: loop header
LB: loop body
LE: loop exit
PB: predicated region body
PF: predicated region fallthrough
CT: control target
= control target key end

     0   :  { %s1318_s0 = inlined_call_operand.hbm [shape: f32[2,8,32], index: 0, kind: input, shape index: {}]   ;;  %s1319_s1 = inlined_call_operand.hbm [shape: f32[2,8,32], index: 1, kind: input, shape index: {}]   ;;  %s1320_s2 = inlined_call_operand.hbm [shape: f32[2,8,32], index: 2, kind: input, shape index: {}]   ;;  %s1321_s3 = inlined_call_operand.vmem [shape: s8[2,8,8], index: 3, kind: input, shape index: {}]   ;;  %s1322_s4 = inlined_call_operand.hbm [shape: f32[2,8,32], index: 4, kind: output, shape index: {0}]   ;;  %s1323_s5 = inlined_call_operand.hbm [shape: f32[2,8,8], index: 5, kind: output, shape index: {1}]  }
   0x1   :  { %1327 = sst [smem:[#allocation15_spill]] %s1319_s1 }
   0x2   :  { %11 = vsyncpa [#allocation3], 0 }
   0x3   :  { %13 = vsyncpa [#allocation3 + $0x1], 0 }
   0x4   :  { %14 = vsyncpa [#allocation6], 0 }
   0x5   :  { %15 = vsyncpa [#allocation4], 0 }
   0x6   :  { %17 = vsyncpa [#allocation4 + $0x1], 0 }
   0x7   :  { %18 = vsyncpa [#allocation10], 0 }
   0x8   :  { %20 = vsyncpa [#allocation10 + $0x1], 0  ;;  %s1062_s18 = smov 0   ;;  %s1064_s19 = smov 0  }
   0x9   :  { %s1066_s20 = smov 0   ;;  %s1068_s21 = smov 0  }
   0xa   :  { %s1070_s22 = smov 0   ;;  %s1072_s23 = smov 0  }
   0xb LB: > { %s701_s24 = sadd.s32 4294967295, %s1022_s23   ;;  %s702_s25 = sadd.s32 4294967294, %s1022_s23   ;;  %s1022_s23 = sphi %s1072_s23, %s26_s23   ;;  %s1018_s22 = sphi %s1070_s22, %s1345_s22   ;;  %s1014_s21 = sphi %s1068_s21, %s1344_s21   ;;  %s1010_s20 = sphi %s1066_s20, %s1343_s20   ;;  %s1006_s19 = sphi %s1064_s19, %s1342_s19   ;;  %s1002_s18 = sphi %s1062_s18, %s1341_s18  }
   0xc   : > { %p60_p0 = scmp.ne.s32.totalorder %s1006_s19, %s1002_s18  ;;  %p61_p1 = scmp.eq.s32.totalorder %s701_s24, 0 }
   0xd   : > { %p1096_p2 = scmp.eq.s32.totalorder %s701_s24, 1  ;;  %p172_p3 = scmp.eq.s32.totalorder %s702_s25, 1 }
   0xe   : > { %p1100_p4 = por %p61_p1, %p60_p0  ;;  %p703_p5 = scmp.ge.s32.totalorder %s1022_s23, 1 }
   0xf   : > { %s1328_s26 = scalar_select %p1096_p2, 1, 0 }
  0x10   : > { %s1329_s27 = scalar_select %p1100_p4, 1, 0 }
  0x11   : > { %p1105_p6 = por %p172_p3, %p60_p0  ;;  %p207_p7 = scmp.lt.s32.totalorder %s1022_s23, 3 }
  0x12   : > { %s1111_s29 = sshll.u32 %s1014_s21, 7  ;;  %s1332_s1 = sld [smem:[#allocation15_spill]] }
  0x13   : > { %s1330_s28 = scalar_select %p1105_p6, 1, 0 }
  0x14   : > { %p1113_p8 = pnand %p703_p5, %p207_p7  ;;  %s1024_s9 = smov [#allocation5]  }
  0x15   : > { %s222_s10 = sshll.u32 %s1024_s9, 4  ;;  %s1130_s13 = scalar_lea.hbm %s1320_s2, %s1111_s29  ;;  %s223_s10 = int_to_ptr.vmem [resolvable:$true] %s222_s10 }
  0x16   : > { %s1331_s30 = scalar_select %p1113_p8, 1, 0 }
  0x17   : > { %p747_p10 = pneg %p1113_p8  ;;  %s1025_s15 = smov [#allocation7]  }
  0x18   : > { %s1121_s8 = scalar_lea.hbm %s1332_s1, %s1111_s29  ;;  %s235_s16 = sshll.u32 %s1025_s15, 4  ;;  %s1138_s16 = int_to_ptr.vmem [resolvable:$true] %s235_s16 }
  0x19   : > { %p1134_p11 = pnand %p747_p10, %p1100_p4  ;;  %s824_s17 = scalar_lea.hbm %s1121_s8, 128 }
  0x1a   : > { %p825_p12 = scmp.ne.s32.totalorder %s1121_s8, %s824_s17  ;;  %s829_s6 = scalar_lea.hbm %s1332_s1, 256 }
  0x1b   : > { %p826_p13 = pneg %p1134_p11  ;;  %p830_p3 = scmp.lt.s32.totalorder %s1121_s8, %s1332_s1 }
  0x1c   : > { %p831_p5 = scmp.lt.s32.totalorder %s829_s6, %s824_s17 }
  0x1d   : > { %p827_p0 = pnand %p826_p13, %p825_p12 }
  0x1e   : > { %p832_p7 = por %p831_p5, %p830_p3 }
  0x1f   : > { %p828_p1 = pneg %p827_p0 }
  0x21   : > { %p833_p10 = pnand %p832_p7, %p828_p1 }
  0x23   : > { %836 = shalt.err (!%p833_p10)
}
  0x24   : > { %s837_s11 = scalar_lea.vmem %s223_s10, 128  ;;  %p845_p0 = scmp.lt.s32.totalorder %s223_s10, %s223_s10 }
  0x25   : > { %p838_p9 = scmp.ne.s32.totalorder %s223_s10, %s837_s11  ;;  %p846_p4 = scmp.lt.s32.totalorder %s837_s11, %s837_s11 }
  0x27   : > { %p840_p6 = pnand %p838_p9, %p826_p13  ;;  %p847_p8 = por %p846_p4, %p845_p0 }
  0x29   : > { %p841_p12 = pneg %p840_p6 }
  0x2b   : > { %p848_p2 = pnand %p847_p8, %p841_p12 }
  0x2d   : > { %851 = shalt.err (!%p848_p2)
}
  0x2e   : > { %750 = dma.hbm_to_vmem [thread:$0]  (!%p1134_p11), %s1121_s8, 128, %s223_s10, [#allocation6]  }
  0x2f   : > { %s852_s12 = scalar_lea.hbm %s1130_s13, 128  ;;  %s857_s24 = scalar_lea.hbm %s1320_s2, 256 }
  0x30   : > { %p853_p1 = scmp.ne.s32.totalorder %s1130_s13, %s852_s12  ;;  %p858_p2 = scmp.lt.s32.totalorder %s1130_s13, %s1320_s2 }
  0x31   : > { %p859_p4 = scmp.lt.s32.totalorder %s857_s24, %s852_s12 }
  0x32   : > { %p855_p3 = pnand %p853_p1, %p826_p13 }
  0x33   : > { %p860_p6 = por %p859_p4, %p858_p2 }
  0x34   : > { %p856_p9 = pneg %p855_p3 }
  0x36   : > { %p861_p8 = pnand %p860_p6, %p856_p9 }
  0x38   : > { %864 = shalt.err (!%p861_p8)
}
  0x39   : > { %s865_s8 = scalar_lea.vmem %s1138_s16, 128  ;;  %p873_p12 = scmp.lt.s32.totalorder %s1138_s16, %s1138_s16 }
  0x3a   : > { %p866_p5 = scmp.ne.s32.totalorder %s1138_s16, %s865_s8  ;;  %p874_p0 = scmp.lt.s32.totalorder %s865_s8, %s865_s8 }
  0x3c   : > { %p868_p7 = pnand %p866_p5, %p826_p13  ;;  %p875_p1 = por %p874_p0, %p873_p12 }
  0x3e   : > { %p869_p10 = pneg %p868_p7 }
  0x40   : > { %p876_p3 = pnand %p875_p1, %p869_p10 }
  0x42   : > { %879 = shalt.err (!%p876_p3)
}
  0x43   : > { %753 = dma.hbm_to_vmem [thread:$0]  (!%p1134_p11), %s1130_s13, 128, %s1138_s16, [#allocation6]  }
  0x44   : > { %s38_s10 = sadd.s32 1, %s1018_s22  ;;  %s47_s7 = sadd.s32 1, %s1010_s20 }
  0x45   : > { %p40_p13 = scmp.ge.s32.totalorder %s38_s10, 2  ;;  %p54_p9 = scmp.ne.s32.totalorder %s1010_s20, %s1006_s19 }
  0x46   : > { %p55_p2 = scmp.eq.s32.totalorder %s1022_s23, 0  ;;  %p765_p4 = scmp.lt.s32.totalorder %s1022_s23, 2 }
  0x47   : > { %s1347_s10 = smov (%p40_p13, %s38_s10), 0  ;;  %p1334_p8 = scmp.ne.s32.totalorder %s1328_s26, 0 }
  0x48   : > { %p56_p6 = por %p55_p2, %p54_p9  ;;  %s42_s9 = ssub.s32 %s1018_s22, %s1347_s10 }
  0x49   : > { %p1193_p5 = por %p1334_p8, %p54_p9  ;;  %s246_s11 = sand.u32 1, %s1010_s20  }
  0x4a   : > { %p45_p7 = scmp.eq.s32.totalorder %s42_s9, 0  ;;  %s707_s13 = sshll.u32 %s246_s11, 3 }
  0x4b   : > { %s708_s16 = sshll.u32 %s1018_s22, 7  ;;  %s250_s25 = scalar_lea.vmem [#allocation2], %s707_s13 }
  0x4c   : > { %s1202_s12 = scalar_select %p45_p7, %s1010_s20, %s47_s7  }
  0x4d   : > { %s256_s24 = scalar_lea.hbm %s1318_s0, %s708_s16  ;;  %s258_s6 = sshll.u32 %s250_s25, 4  ;;  %s259_s6 = int_to_ptr.vmem [resolvable:$true] %s258_s6 }
  0x4e   : > { %p1209_p11 = pnand %p765_p4, %p56_p6  ;;  %s247_s8 = scalar_lea.sflag [#allocation3], %s246_s11 }
  0x4f   : > { %s893_s9 = scalar_lea.vmem %s259_s6, 128  ;;  %s1026_s7 = smov [#allocation2]  }
  0x50   : > { %p882_p10 = pneg %p1209_p11  ;;  %p894_p12 = scmp.ne.s32.totalorder %s259_s6, %s893_s9 }
  0x51   : > { %s898_s1 = sshll.u32 %s1026_s7, 4  ;;  %s899_s1 = int_to_ptr.vmem [resolvable:$false] %s898_s1 }
  0x52   : > { %p896_p0 = pnand %p894_p12, %p882_p10  ;;  %s900_s16 = scalar_lea.vmem %s899_s1, 256 }
  0x53   : > { %p901_p3 = scmp.lt.s32.totalorder %s259_s6, %s899_s1  ;;  %p902_p13 = scmp.lt.s32.totalorder %s900_s16, %s893_s9 }
  0x54   : > { %p897_p1 = pneg %p896_p0 }
  0x55   : > { %p903_p9 = por %p902_p13, %p901_p3 }
  0x57   : > { %p904_p2 = pnand %p903_p9, %p897_p1 }
  0x59   : > { %907 = shalt.err (!%p904_p2)
}
  0x5a   : > { %757 = dma.hbm_to_vmem [thread:$0]  (!%p1209_p11), %s256_s24, 128, %s259_s6, %s247_s8  }
  0x5b   : > { %p1337_p4 = scmp.ne.s32.totalorder %s1331_s30, 0 }
  0x5c   : > { %s1220_s11 = sand.u32 (!%p1337_p4), 1, %s1006_s19   ;;  %p1338_p6 = scmp.ne.s32.totalorder (!%p1337_p4), %s1329_s27, 0 }
  0x5d   : > { %277 = sbr.rel (%p1337_p4) target bundleno = 822 (0x336), region = 36  ;;  %s1223_s13 = sshll.u32 (!%p1337_p4), %s1220_s11, 3 }
  0x5e   : > { %s280_s1 = scalar_lea.sflag (!%p1337_p4), [#allocation3], %s1220_s11  ;;  %s283_s15 = scalar_lea.vmem (!%p1337_p4), [#allocation2], %s1223_s13 }
  0x62   : > { %985 = dma.done.wait (%p1338_p6), %s280_s1, 128  }
  0x63   : > { %987 = vsyncadd (%p1338_p6), %s280_s1, 4294967168 }
  0x64   : > { %989 = dma.done.wait (%p1338_p6), [#allocation6], 256  }
  0x65   : > { %991 = vsyncadd (%p1338_p6), [#allocation6], 4294967040  ;;  %v1027_v0 = vmov 0.0   ;;  %vm1028_vm0 = vmmov 0   ;;  %vm343_vm1 = vcmask 261120   ;;  %v341_v1 = vld [vmem:[#allocation5] sm:$0xff]  ;;  %s548_s8 = scalar_lea.hbm %s1323_s5, %s1111_s29 }
  0x66   : > { %727 = vmatprep.subr.mxu0 %v1027_v0  ;;  %729 = vmatprep.mubr.msk.f32.mxu0 %vm1028_vm0, %v1027_v0  ;;  %v339_v2 = vld [vmem:[%s283_s15] sm:$0xff]  ;;  %p330_p8 = scmp.lt.s32.totalorder %s1014_s21, 1  ;;  %v1029_v5 = vmov 0   ;;  %vm426_vm4 = vcmask 64512   ;;  %v342_v18 = vld [vmem:[#allocation7] sm:$0xff]  ;;  %s522_s9 = scalar_lea.sflag [#allocation10], %s1220_s11 }
  0x67   : > { %732 = vmatprep.subr.mxu1 %v1027_v0  ;;  %734 = vmatprep.mubr.msk.f32.mxu1 %vm1028_vm0, %v1027_v0  ;;  %v340_v3 = vmul.f32 0.17677669, %v339_v2  ;;  %s1030_s16 = smov [#allocation9]  }
  0x68   : > { %728 = vmatpush3.xpose.msk.msra.mxu0 %vm343_vm1, %v341_v1  ;;  %s1349_s21 = smov (!%p330_p8, %s1014_s21), 1  ;;  %733 = vmatpush3.msra.mxu1 %v342_v18  ;;  %s912_s1 = sshll.u32 %s1030_s16, 4  ;;  %s913_s1 = int_to_ptr.vmem [resolvable:$false] %s912_s1 }
  0x69   : > { %s713_s27 = sshll.u32 %s1349_s21, 1  ;;  %s329_s21 = scalar_lea.vmem [#allocation9], %s1223_s13 }
  0x6a   : > { %s336_s24 = scalar_lea.vmem %s1321_s3, %s713_s27  ;;  %s550_s25 = sshll.u32 %s329_s21, 4  ;;  %s551_s25 = int_to_ptr.vmem [resolvable:$true] %s550_s25 }
  0x6b   : > { %730 = vmatmul.mubr.msk.f32.vlgmr.msra.gmra.mxu0 %vm343_vm1, %v340_v3  ;;  %v420_v4 = vld [vmem:[%s336_s24] sm:$0x3]  ;;  %s908_s7 = scalar_lea.vmem %s551_s25, 128  ;;  %s914_s15 = scalar_lea.vmem %s913_s1, 256 }
  0x6c   : > { %vm421_vm2 = vnez %v420_v4  ;;  %p909_p7 = scmp.ne.s32.totalorder %s551_s25, %s908_s7  ;;  %p915_p12 = scmp.lt.s32.totalorder %s551_s25, %s913_s1 }
  0x6d   : > { %v422_v6 = vsel %vm421_vm2, 16843009, %v1029_v5  ;;  %p916_p0 = scmp.lt.s32.totalorder %s914_s15, %s908_s7 }
  0x6e   : > { %v423_v7 = vunpack.c.0.s8 %v422_v6  ;;  %p910_p11 = pnand %p909_p7, %p1193_p5 }
  0x6f   : > { %p917_p1 = por %p916_p0, %p915_p12 }
  0x70   : > { %vm424_vm3 = vcmp.ne.s32.totalorder %v423_v7, 0  ;;  %p911_p10 = pneg %p910_p11 }
  0x72   : > { %p918_p3 = pnand %p917_p1, %p911_p10 }
 0x12b   : > { %v416_v8 = vpop.f32.mrf.mxu0 }
 0x12c   : > { %v425_v9 = vsel %vm424_vm3, -1e+30, %v416_v8 }
 0x12d   : > { %v731_v10 = vpop.f32.mrf.mxu0  ;;  %v427_v11 = vsel %vm426_vm4, %v425_v9, -inf }
 0x12e   : > { %428 = vmax.xlane.f32.xlu0 %v427_v11 }
 0x1b7   : > { %v429_v12 = vpop.xlane.xlu0 %428 }
 0x1b8   : > { %v430_v13 = vsub.f32 %v425_v9, %v429_v12 }
 0x1ba   : > { %v431_v14 = vmul.f32 1.442695, %v430_v13 }
 0x1bc   : > { %820 = vpow2.f32 %v431_v14 }
 0x1c9   : > { %v821_v15 = vpop.eup %820 }
 0x1ca   : > { %v433_v16 = vsel %vm424_vm3, 0.0, %v821_v15 }
 0x1cb   : > { %v434_v17 = vsel %vm426_vm4, %v433_v16, 0.0 }
 0x1cc   : > { %435 = vadd.xlane.f32.xlu0 %v434_v17 }
 0x255   : > { %v436_v19 = vpop.xlane.xlu0 %435 }
 0x256   : > { %822 = vrcp.f32 %v436_v19  ;;  %vm437_vm5 = vcmp.gt.f32.partialorder %v436_v19, 0.0 }
 0x263   : > { %v823_v20 = vpop.eup %822 }
 0x264   : > { %v439_v21 = vsel %vm437_vm5, %v823_v20, 0.0 }
 0x265   : > { %v440_v22 = vmul.f32 %v439_v21, %v433_v16 }
 0x267   : > { %735 = vmatmul.mubr.msk.f32.vlgmr.msra.gmra.mxu1 %vm426_vm4, %v440_v22  ;;  %514 = vst.msk [vmem:[%s329_s21] sm:$0xff] %vm426_vm4, %v440_v22 }
 0x268   : > { %921 = shalt.err (!%p918_p3)
}
 0x269   : > { %s922_s27 = scalar_lea.hbm %s548_s8, 128  ;;  %s926_s24 = scalar_lea.hbm %s1323_s5, 256 }
 0x26a   : > { %p923_p13 = scmp.ne.s32.totalorder %s548_s8, %s922_s27  ;;  %p927_p4 = scmp.lt.s32.totalorder %s548_s8, %s1323_s5 }
 0x26b   : > { %p928_p6 = scmp.lt.s32.totalorder %s926_s24, %s922_s27 }
 0x26c   : > { %p924_p9 = pnand %p923_p13, %p1193_p5 }
 0x26d   : > { %p929_p8 = por %p928_p6, %p927_p4 }
 0x26e   : > { %p925_p2 = pneg %p924_p9 }
 0x270   : > { %p930_p7 = pnand %p929_p8, %p925_p2 }
 0x272   : > { %933 = shalt.err (!%p930_p7)
}
 0x273   : > { %744 = dma.vmem_to_hbm [thread:$0]  (%p1193_p5), %s551_s25, 128, %s548_s8, %s522_s9  }
 0x274   : > { %s322_s26 = scalar_lea.vmem [#allocation8], %s1223_s13  ;;  %s1269_s15 = scalar_lea.hbm %s1322_s4, %s1111_s29 }
 0x275   : > { %s536_s7 = sshll.u32 %s322_s26, 4  ;;  %s517_s27 = scalar_lea.sflag [#allocation4], %s1220_s11  ;;  %s1271_s7 = int_to_ptr.vmem [resolvable:$true] %s536_s7 }
 0x276   : > { %s934_s30 = scalar_lea.vmem %s1271_s7, 128  ;;  %s1031_s13 = smov [#allocation8]  }
 0x277   : > { %p935_p11 = scmp.ne.s32.totalorder %s1271_s7, %s934_s30  ;;  %s938_s25 = sshll.u32 %s1031_s13, 4  ;;  %s939_s25 = int_to_ptr.vmem [resolvable:$false] %s938_s25 }
 0x278   : > { %s940_s29 = scalar_lea.vmem %s939_s25, 256  ;;  %p941_p0 = scmp.lt.s32.totalorder %s1271_s7, %s939_s25 }
 0x279   : > { %p936_p10 = pnand %p935_p11, %p1193_p5  ;;  %p942_p1 = scmp.lt.s32.totalorder %s940_s29, %s934_s30 }
 0x27b   : > { %p937_p12 = pneg %p936_p10  ;;  %p943_p3 = por %p942_p1, %p941_p0 }
 0x27d   : > { %p944_p13 = pnand %p943_p3, %p937_p12 }
 0x327   : > { %v510_v23 = vpop.f32.mrf.mxu1 }
 0x328   : > { %515 = vst.msk [vmem:[%s322_s26] sm:$0xff] %vm343_vm1, %v510_v23 }
 0x329   : > { %v736_v24 = vpop.f32.mrf.mxu1 }
 0x32a   : > { %947 = shalt.err (!%p944_p13)
}
 0x32b   : > { %s948_s8 = scalar_lea.hbm %s1269_s15, 128  ;;  %s952_s17 = scalar_lea.hbm %s1322_s4, 256 }
 0x32c   : > { %p949_p9 = scmp.ne.s32.totalorder %s1269_s15, %s948_s8  ;;  %p953_p6 = scmp.lt.s32.totalorder %s1269_s15, %s1322_s4 }
 0x32d   : > { %p954_p8 = scmp.lt.s32.totalorder %s952_s17, %s948_s8 }
 0x32e   : > { %p950_p2 = pnand %p949_p9, %p1193_p5 }
 0x32f   : > { %p955_p7 = por %p954_p8, %p953_p6 }
 0x330   : > { %p951_p4 = pneg %p950_p2 }
 0x332   : > { %p956_p11 = pnand %p955_p7, %p951_p4 }
 0x334   : > { %959 = shalt.err (!%p956_p11)
}
 0x335   : > { %743 = dma.vmem_to_hbm [thread:$0]  (%p1193_p5), %s1271_s7, 128, %s1269_s15, %s517_s27  }
 0x336 PF: > { %s562_s6 = sand.u32 1, %s1002_s18   ;;  %p1339_p10 = scmp.ne.s32.totalorder %s1330_s28, 0 }
 0x337   : > { %p1340_p12 = scmp.ge.s32.totalorder %s1022_s23, 2  ;;  %s563_s26 = scalar_lea.sflag [#allocation4], %s562_s6 }
 0x339   : > { %p759_p0 = pnand %p1340_p12, %p1339_p10 }
 0x33b   : > { %p760_p1 = pneg %p759_p0 }
 0x33d   : > { %993 = dma.done.wait (%p760_p1), %s563_s26, 128  }
 0x33e   : > { %995 = vsyncadd (%p760_p1), %s563_s26, 4294967168  ;;  %s572_s16 = scalar_lea.sflag [#allocation10], %s562_s6 }
 0x33f   : > { %997 = dma.done.wait (%p760_p1), %s572_s16, 128  }
 0x340   : > { %999 = vsyncadd (%p760_p1), %s572_s16, 4294967168  ;;  %s26_s23 = sadd.s32 1, %s1022_s23   ;;  %s1341_s18 = smov %s1006_s19 }
 0x341   : > { %p23_p3 = scmp.ge.s32.totalorder %s26_s23, 4   ;;  %s1342_s19 = smov %s1010_s20 }
 0x342   : > { %s1343_s20 = smov %s1202_s12  ;;  %s1344_s21 = smov %s1018_s22 }
 0x343   : > { %s1345_s22 = smov %s1347_s10  ;;  %25 = sbr.rel (!%p23_p3) target bundleno = 11 (0xb), region = 111 }
 0x348   :  { %577 = vsyncpa [#allocation3], 1 }
 0x349   :  { %579 = vsyncpa [#allocation3 + $0x1], 1 }
 0x34a   :  { %580 = vsyncpa [#allocation6], 1 }
 0x34b   :  { %581 = vsyncpa [#allocation4], 1 }
 0x34c   :  { %583 = vsyncpa [#allocation4 + $0x1], 1 }
 0x34d   :  { %584 = vsyncpa [#allocation10], 1 }
 0x34e   :  { %586 = vsyncpa [#allocation10 + $0x1], 1 }

// kernel: tpu_custom_call.1
= control target key start
LH: loop header
LB: loop body
LE: loop exit
PB: predicated region body
PF: predicated region fallthrough
CT: control target
= control target key end

     0   :  { %s1358_s0 = inlined_call_operand.hbm [shape: f32[2,8,32], index: 0, kind: input, shape index: {}]   ;;  %s1359_s1 = inlined_call_operand.hbm [shape: f32[2,8,32], index: 1, kind: input, shape index: {}]   ;;  %s1360_s2 = inlined_call_operand.hbm [shape: f32[2,8,32], index: 2, kind: input, shape index: {}]   ;;  %s1361_s3 = inlined_call_operand.vmem [shape: s8[2,8,8], index: 3, kind: input, shape index: {}]   ;;  %s1362_s4 = inlined_call_operand.hbm [shape: f32[2,8,32], index: 4, kind: output, shape index: {0}]   ;;  %s1363_s5 = inlined_call_operand.hbm [shape: f32[2,8,8], index: 5, kind: output, shape index: {1}]  }
   0x1   :  { %1369 = sst [smem:[#allocation19_spill]] %s1359_s1 }
   0x2   :  { %11 = vsyncpa [#allocation3], 0 }
   0x3   :  { %13 = vsyncpa [#allocation3 + $0x1], 0 }
   0x4   :  { %14 = vsyncpa [#allocation6], 0 }
   0x5   :  { %16 = vsyncpa [#allocation6 + $0x1], 0 }
   0x6   :  { %17 = vsyncpa [#allocation4], 0 }
   0x7   :  { %19 = vsyncpa [#allocation4 + $0x1], 0 }
   0x8   :  { %20 = vsyncpa [#allocation10], 0 }
   0x9   :  { %22 = vsyncpa [#allocation10 + $0x1], 0  ;;  %s1115_s18 = smov 0   ;;  %s1117_s19 = smov 0  }
   0xa   :  { %s1119_s20 = smov 0   ;;  %s1121_s21 = smov 0  }
   0xb   :  { %s1123_s22 = smov 0   ;;  %s1125_s23 = smov 0  }
   0xc LB: > { %1370 = sst [smem:[#allocation15_spill]] %s1071_s22  ;;  %s1146_s24 = sadd.s32 4294967295, %s1075_s23   ;;  %s1075_s23 = sphi %s1125_s23, %s28_s23   ;;  %s1071_s22 = sphi %s1123_s22, %s1386_s22   ;;  %s1067_s21 = sphi %s1121_s21, %s1385_s21   ;;  %s1063_s20 = sphi %s1119_s20, %s1389_s20   ;;  %s1059_s19 = sphi %s1117_s19, %s1388_s19   ;;  %s1055_s18 = sphi %s1115_s18, %s1387_s18  }
   0xd   : > { %1371 = sst [smem:[#allocation16_spill]] %s1075_s23  ;;  %s754_s25 = sadd.s32 4294967294, %s1075_s23  }
   0xe   : > { %s40_s26 = sadd.s32 1, %s1071_s22  ;;  %s49_s27 = sadd.s32 1, %s1063_s20 }
   0xf   : > { %p42_p0 = scmp.ge.s32.totalorder %s40_s26, 2  ;;  %p56_p1 = scmp.ne.s32.totalorder %s1063_s20, %s1059_s19 }
  0x10   : > { %p57_p2 = scmp.eq.s32.totalorder %s1075_s23, 0  ;;  %p62_p3 = scmp.ne.s32.totalorder %s1059_s19, %s1055_s18 }
  0x11   : > { %s1391_s26 = smov (%p42_p0, %s40_s26), 0  ;;  %p63_p5 = scmp.eq.s32.totalorder %s1146_s24, 0 }
  0x12   : > { %1372 = sst [smem:[#allocation17_spill]] %s1391_s26  ;;  %p1158_p4 = por %p57_p2, %p56_p1 }
  0x13   : > { %s44_s29 = ssub.s32 %s1071_s22, %s1391_s26  ;;  %p168_p6 = scmp.eq.s32.totalorder %s1146_s24, 1 }
  0x14   : > { %p47_p7 = scmp.eq.s32.totalorder %s44_s29, 0  ;;  %p1166_p8 = por %p63_p5, %p62_p3 }
  0x15   : > { %p1170_p9 = por %p168_p6, %p56_p1  ;;  %p174_p10 = scmp.eq.s32.totalorder %s754_s25, 1 }
  0x16   : > { %s1175_s7 = scalar_select %p47_p7, %s1063_s20, %s49_s27  }
  0x17   : > { %p1177_p11 = por %p174_p10, %p62_p3  ;;  %p820_p13 = scmp.lt.s32.totalorder %s1075_s23, 2 }
  0x18   : > { %1376 = sst [smem:[#allocation18_spill]] %s1175_s7  ;;  %s1364_s9 = sand.u32 1, %s1063_s20  }
  0x19   : > { %s1186_s10 = sshll.u32 %s1364_s9, 3  ;;  %s1189_s11 = sshll.u32 %s1071_s22, 7 }
  0x1a   : > { %p1193_p0 = pnand %p820_p13, %p1158_p4  ;;  %s241_s13 = sand.u32 1, %s1075_s23  }
  0x1b   : > { %s1379_s1 = sld [smem:[#allocation19_spill]]  ;;  %s245_s17 = scalar_lea.vmem [#allocation5], %s1186_s10 }
  0x1c   : > { %s252_s25 = sshll.u32 %s245_s17, 4  ;;  %p763_p1 = scmp.ge.s32.totalorder %s1075_s23, 1  ;;  %s253_s25 = int_to_ptr.vmem [resolvable:$true] %s252_s25 }
  0x1d   : > { %p285_p2 = scmp.lt.s32.totalorder %s1075_s23, 3  ;;  %s1205_s27 = scalar_lea.sflag [#allocation6], %s241_s13 }
  0x1e   : > { %p879_p3 = pneg %p1193_p0  ;;  %s890_s28 = scalar_lea.vmem %s253_s25, 128 }
  0x1f   : > { %p891_p4 = scmp.ne.s32.totalorder %s253_s25, %s890_s28  ;;  %s1077_s29 = smov [#allocation5]  }
  0x20   : > { %s895_s9 = sshll.u32 %s1077_s29, 4  ;;  %s896_s9 = int_to_ptr.vmem [resolvable:$false] %s895_s9 }
  0x21   : > { %s250_s16 = scalar_lea.hbm %s1379_s1, %s1189_s11  ;;  %p893_p5 = pnand %p891_p4, %p879_p3 }
  0x22   : > { %s897_s14 = scalar_lea.vmem %s896_s9, 256  ;;  %p898_p7 = scmp.lt.s32.totalorder %s253_s25, %s896_s9 }
  0x23   : > { %p894_p6 = pneg %p893_p5  ;;  %p899_p10 = scmp.lt.s32.totalorder %s897_s14, %s890_s28 }
  0x25   : > { %p900_p13 = por %p899_p10, %p898_p7 }
  0x27   : > { %p901_p12 = pnand %p900_p13, %p894_p6 }
  0x29   : > { %904 = shalt.err (!%p901_p12)
}
  0x2a   : > { %809 = dma.hbm_to_vmem [thread:$0]  (!%p1193_p0), %s250_s16, 128, %s253_s25, %s1205_s27  }
  0x2b   : > { %p1219_p4 = pnand %p763_p1, %p285_p2  ;;  %s232_s17 = scalar_lea.hbm %s1358_s0, %s1189_s11 }
  0x2c   : > { %s226_s28 = scalar_lea.vmem [#allocation2], %s1186_s10  ;;  %s268_s26 = scalar_lea.hbm %s1360_s2, %s1189_s11 }
  0x2d   : > { %s234_s29 = sshll.u32 %s226_s28, 4  ;;  %s1381_s22 = sand.u32 1, %s1063_s20   ;;  %s235_s29 = int_to_ptr.vmem [resolvable:$true] %s234_s29 }
  0x2e   : > { %s223_s7 = scalar_lea.sflag [#allocation3], %s1381_s22  ;;  %s918_s16 = scalar_lea.vmem %s235_s29, 128 }
  0x2f   : > { %p919_p12 = scmp.ne.s32.totalorder %s235_s29, %s918_s16  ;;  %s1078_s25 = smov [#allocation2]  }
  0x30   : > { %s923_s23 = sshll.u32 %s1078_s25, 4  ;;  %s924_s23 = int_to_ptr.vmem [resolvable:$false] %s923_s23 }
  0x31   : > { %p921_p1 = pnand %p919_p12, %p879_p3  ;;  %s925_s9 = scalar_lea.vmem %s924_s23, 256 }
  0x32   : > { %p926_p5 = scmp.lt.s32.totalorder %s235_s29, %s924_s23  ;;  %p927_p6 = scmp.lt.s32.totalorder %s925_s9, %s918_s16 }
  0x33   : > { %p922_p2 = pneg %p921_p1 }
  0x34   : > { %p928_p7 = por %p927_p6, %p926_p5 }
  0x36   : > { %p929_p10 = pnand %p928_p7, %p922_p2 }
  0x38   : > { %932 = shalt.err (!%p929_p10)
}
  0x39   : > { %806 = dma.hbm_to_vmem [thread:$0]  (!%p1193_p0), %s232_s17, 128, %s235_s29, %s223_s7  }
  0x3a   : > { %s263_s1 = scalar_lea.vmem [#allocation7], %s1186_s10  ;;  %s1079_s28 = smov [#allocation7]  }
  0x3b   : > { %s270_s22 = sshll.u32 %s263_s1, 4  ;;  %s951_s23 = sshll.u32 %s1079_s28, 4  ;;  %s271_s22 = int_to_ptr.vmem [resolvable:$true] %s270_s22  ;;  %s952_s23 = int_to_ptr.vmem [resolvable:$false] %s951_s23 }
  0x3c   : > { %s946_s15 = scalar_lea.vmem %s271_s22, 128  ;;  %s953_s14 = scalar_lea.vmem %s952_s23, 256 }
  0x3d   : > { %p947_p13 = scmp.ne.s32.totalorder %s271_s22, %s946_s15  ;;  %p954_p2 = scmp.lt.s32.totalorder %s271_s22, %s952_s23 }
  0x3e   : > { %p955_p5 = scmp.lt.s32.totalorder %s953_s14, %s946_s15 }
  0x3f   : > { %p949_p12 = pnand %p947_p13, %p879_p3 }
  0x40   : > { %p956_p6 = por %p955_p5, %p954_p2 }
  0x41   : > { %p950_p1 = pneg %p949_p12 }
  0x43   : > { %p957_p7 = pnand %p956_p6, %p950_p1 }
  0x45   : > { %960 = shalt.err (!%p957_p7)
}
  0x46   : > { %812 = dma.hbm_to_vmem [thread:$0]  (!%p1193_p0), %s268_s26, 128, %s271_s22, %s1205_s27  }
  0x47   : > { %289 = sbr.rel (%p1219_p4) target bundleno = 801 (0x321), region = 36  ;;  %s1254_s17 = sand.u32 (!%p1219_p4), 1, %s1059_s19  }
  0x48   : > { %s1257_s29 = sshll.u32 (!%p1219_p4), %s1254_s17, 3  ;;  %s292_s12 = scalar_lea.sflag (!%p1219_p4), [#allocation3], %s1254_s17 }
  0x49   : > { %s295_s16 = scalar_lea.vmem (!%p1219_p4), [#allocation2], %s1257_s29 }
  0x4c   : > { %1038 = dma.done.wait (%p1166_p8), %s292_s12, 128  }
  0x4d   : > { %1040 = vsyncadd (%p1166_p8), %s292_s12, 4294967168  ;;  %s300_s26 = sand.u32 1, %s1146_s24   ;;  %s304_s27 = scalar_lea.vmem [#allocation5], %s1257_s29 }
  0x4e   : > { %s301_s11 = scalar_lea.sflag [#allocation6], %s300_s26 }
  0x4f   : > { %1042 = dma.done.wait (%p1166_p8), %s301_s11, 256  }
  0x50   : > { %1044 = vsyncadd (%p1166_p8), %s301_s11, 4294967040  ;;  %v1080_v0 = vmov 0.0   ;;  %vm1081_vm0 = vmmov 0   ;;  %vm375_vm1 = vcmask 261120   ;;  %v373_v1 = vld [vmem:[%s304_s27] sm:$0xff]  ;;  %v371_v2 = vld [vmem:[%s295_s16] sm:$0xff] }
  0x51   : > { %783 = vmatprep.subr.mxu0 %v1080_v0  ;;  %785 = vmatprep.mubr.msk.f32.mxu0 %vm1081_vm0, %v1080_v0  ;;  %v372_v3 = vmul.f32 0.17677669, %v371_v2  ;;  %p362_p0 = scmp.lt.s32.totalorder %s1067_s21, 1  ;;  %v1082_v5 = vmov 0   ;;  %vm458_vm4 = vcmask 64512   ;;  %s313_s1 = scalar_lea.vmem [#allocation7], %s1257_s29 }
  0x52   : > { %788 = vmatprep.subr.mxu1 %v1080_v0  ;;  %790 = vmatprep.mubr.msk.f32.mxu1 %vm1081_vm0, %v1080_v0  ;;  %v374_v18 = vld [vmem:[%s313_s1] sm:$0xff]  ;;  %s361_s22 = scalar_lea.vmem [#allocation9], %s1257_s29  ;;  %s775_s15 = sshll.u32 %s1067_s21, 7 }
  0x53   : > { %784 = vmatpush3.xpose.msk.msra.mxu0 %vm375_vm1, %v373_v1  ;;  %s363_s24 = scalar_select %p362_p0, %s1067_s21, 1  ;;  %789 = vmatpush3.msra.mxu1 %v374_v18 }
  0x54   : > { %s580_s14 = scalar_lea.hbm %s1363_s5, %s775_s15  ;;  %s582_s7 = sshll.u32 %s361_s22, 4  ;;  %s583_s7 = int_to_ptr.vmem [resolvable:$true] %s582_s7 }
  0x55   : > { %s769_s30 = sshll.u32 %s363_s24, 1  ;;  %s554_s10 = scalar_lea.sflag [#allocation10], %s1254_s17 }
  0x56   : > { %786 = vmatmul.mubr.msk.f32.vlgmr.msra.gmra.mxu0 %vm375_vm1, %v372_v3  ;;  %s368_s9 = scalar_lea.vmem %s1361_s3, %s769_s30  ;;  %s961_s12 = scalar_lea.vmem %s583_s7, 128 }
  0x57   : > { %v452_v4 = vld [vmem:[%s368_s9] sm:$0x3]  ;;  %p962_p8 = scmp.ne.s32.totalorder %s583_s7, %s961_s12  ;;  %s1083_s16 = smov [#allocation9]  }
  0x58   : > { %vm453_vm2 = vnez %v452_v4  ;;  %s965_s26 = sshll.u32 %s1083_s16, 4  ;;  %s966_s26 = int_to_ptr.vmem [resolvable:$false] %s965_s26 }
  0x59   : > { %v454_v6 = vsel %vm453_vm2, 16843009, %v1082_v5  ;;  %p963_p3 = pnand %p962_p8, %p1170_p9  ;;  %s967_s11 = scalar_lea.vmem %s966_s26, 256 }
  0x5a   : > { %v455_v7 = vunpack.c.0.s8 %v454_v6  ;;  %p968_p10 = scmp.lt.s32.totalorder %s583_s7, %s966_s26  ;;  %p969_p13 = scmp.lt.s32.totalorder %s967_s11, %s961_s12 }
  0x5b   : > { %p964_p4 = pneg %p963_p3 }
  0x5c   : > { %vm456_vm3 = vcmp.ne.s32.totalorder %v455_v7, 0  ;;  %p970_p12 = por %p969_p13, %p968_p10 }
  0x5e   : > { %p971_p1 = pnand %p970_p12, %p964_p4 }
 0x116   : > { %v448_v8 = vpop.f32.mrf.mxu0 }
 0x117   : > { %v457_v9 = vsel %vm456_vm3, -1e+30, %v448_v8 }
 0x118   : > { %v787_v10 = vpop.f32.mrf.mxu0  ;;  %v459_v11 = vsel %vm458_vm4, %v457_v9, -inf }
 0x119   : > { %460 = vmax.xlane.f32.xlu0 %v459_v11 }
 0x1a2   : > { %v461_v12 = vpop.xlane.xlu0 %460 }
 0x1a3   : > { %v462_v13 = vsub.f32 %v457_v9, %v461_v12 }
 0x1a5   : > { %v463_v14 = vmul.f32 1.442695, %v462_v13 }
 0x1a7   : > { %873 = vpow2.f32 %v463_v14 }
 0x1b4   : > { %v874_v15 = vpop.eup %873 }
 0x1b5   : > { %v465_v16 = vsel %vm456_vm3, 0.0, %v874_v15 }
 0x1b6   : > { %v466_v17 = vsel %vm458_vm4, %v465_v16, 0.0 }
 0x1b7   : > { %467 = vadd.xlane.f32.xlu0 %v466_v17 }
 0x240   : > { %v468_v19 = vpop.xlane.xlu0 %467 }
 0x241   : > { %875 = vrcp.f32 %v468_v19  ;;  %vm469_vm5 = vcmp.gt.f32.partialorder %v468_v19, 0.0 }
 0x24e   : > { %v876_v20 = vpop.eup %875 }
 0x24f   : > { %v471_v21 = vsel %vm469_vm5, %v876_v20, 0.0 }
 0x250   : > { %v472_v22 = vmul.f32 %v471_v21, %v465_v16 }
 0x252   : > { %791 = vmatmul.mubr.msk.f32.vlgmr.msra.gmra.mxu1 %vm458_vm4, %v472_v22  ;;  %546 = vst.msk [vmem:[%s361_s22] sm:$0xff] %vm458_vm4, %v472_v22 }
 0x253   : > { %974 = shalt.err (!%p971_p1)
}
 0x254   : > { %s975_s27 = scalar_lea.hbm %s580_s14, 128  ;;  %s979_s13 = scalar_lea.hbm %s1363_s5, 256 }
 0x255   : > { %p976_p2 = scmp.ne.s32.totalorder %s580_s14, %s975_s27  ;;  %p980_p7 = scmp.lt.s32.totalorder %s580_s14, %s1363_s5 }
 0x256   : > { %p981_p0 = scmp.lt.s32.totalorder %s979_s13, %s975_s27 }
 0x257   : > { %p977_p5 = pnand %p976_p2, %p1170_p9 }
 0x258   : > { %p982_p8 = por %p981_p0, %p980_p7 }
 0x259   : > { %p978_p6 = pneg %p977_p5 }
 0x25b   : > { %p983_p3 = pnand %p982_p8, %p978_p6 }
 0x25d   : > { %986 = shalt.err (!%p983_p3)
}
 0x25e   : > { %800 = dma.vmem_to_hbm [thread:$0]  (%p1170_p9), %s583_s7, 128, %s580_s14, %s554_s10  }
 0x25f   : > { %s354_s1 = scalar_lea.vmem [#allocation8], %s1257_s29  ;;  %s1309_s12 = scalar_lea.hbm %s1362_s4, %s775_s15 }
 0x260   : > { %s568_s22 = sshll.u32 %s354_s1, 4  ;;  %s549_s16 = scalar_lea.sflag [#allocation4], %s1254_s17  ;;  %s1311_s22 = int_to_ptr.vmem [resolvable:$true] %s568_s22 }
 0x261   : > { %s987_s26 = scalar_lea.vmem %s1311_s22, 128  ;;  %s1084_s21 = smov [#allocation8]  }
 0x262   : > { %p988_p4 = scmp.ne.s32.totalorder %s1311_s22, %s987_s26  ;;  %s991_s29 = sshll.u32 %s1084_s21, 4  ;;  %s992_s29 = int_to_ptr.vmem [resolvable:$false] %s991_s29 }
 0x263   : > { %s993_s15 = scalar_lea.vmem %s992_s29, 256  ;;  %p994_p12 = scmp.lt.s32.totalorder %s1311_s22, %s992_s29 }
 0x264   : > { %p989_p10 = pnand %p988_p4, %p1170_p9  ;;  %p995_p1 = scmp.lt.s32.totalorder %s993_s15, %s987_s26 }
 0x266   : > { %p990_p13 = pneg %p989_p10  ;;  %p996_p2 = por %p995_p1, %p994_p12 }
 0x268   : > { %p997_p5 = pnand %p996_p2, %p990_p13 }
 0x312   : > { %v542_v23 = vpop.f32.mrf.mxu1 }
 0x313   : > { %547 = vst.msk [vmem:[%s354_s1] sm:$0xff] %vm375_vm1, %v542_v23 }
 0x314   : > { %v792_v24 = vpop.f32.mrf.mxu1 }
 0x315   : > { %1000 = shalt.err (!%p997_p5)
}
 0x316   : > { %s1001_s14 = scalar_lea.hbm %s1309_s12, 128  ;;  %s1005_s10 = scalar_lea.hbm %s1362_s4, 256 }
 0x317   : > { %p1002_p6 = scmp.ne.s32.totalorder %s1309_s12, %s1001_s14  ;;  %p1006_p8 = scmp.lt.s32.totalorder %s1309_s12, %s1362_s4 }
 0x318   : > { %p1007_p3 = scmp.lt.s32.totalorder %s1005_s10, %s1001_s14 }
 0x319   : > { %p1003_p7 = pnand %p1002_p6, %p1170_p9 }
 0x31a   : > { %p1008_p4 = por %p1007_p3, %p1006_p8 }
 0x31b   : > { %p1004_p0 = pneg %p1003_p7 }
 0x31d   : > { %p1009_p10 = pnand %p1008_p4, %p1004_p0 }
 0x31f   : > { %1012 = shalt.err (!%p1009_p10)
}
 0x320   : > { %799 = dma.vmem_to_hbm [thread:$0]  (%p1170_p9), %s1311_s22, 128, %s1309_s12, %s549_s16  }
 0x321 PF: > { %s1382_s24 = sld [smem:[#allocation16_spill]]  ;;  %s594_s30 = sand.u32 1, %s1055_s18  }
 0x322   : > { %s595_s13 = scalar_lea.sflag [#allocation4], %s594_s30 }
 0x327   : > { %p1383_p13 = scmp.ge.s32.totalorder %s1382_s24, 2 }
 0x329   : > { %p814_p12 = pnand %p1383_p13, %p1177_p11 }
 0x32b   : > { %p815_p1 = pneg %p814_p12 }
 0x32d   : > { %1046 = dma.done.wait (%p815_p1), %s595_s13, 128  }
 0x32e   : > { %1048 = vsyncadd (%p815_p1), %s595_s13, 4294967168  ;;  %s604_s25 = scalar_lea.sflag [#allocation10], %s594_s30 }
 0x32f   : > { %1050 = dma.done.wait (%p815_p1), %s604_s25, 128  }
 0x330   : > { %1052 = vsyncadd (%p815_p1), %s604_s25, 4294967168  ;;  %s28_s23 = sadd.s32 1, %s1382_s24   ;;  %s1384_s6 = sld [smem:[#allocation18_spill]] }
 0x331   : > { %p25_p2 = scmp.ge.s32.totalorder %s28_s23, 4   ;;  %s1385_s21 = sld [smem:[#allocation15_spill]] }
 0x332   : > { %s1386_s22 = sld [smem:[#allocation17_spill]]  ;;  %s1387_s18 = smov %s1059_s19 }
 0x333   : > { %s1388_s19 = smov %s1063_s20  ;;  %27 = sbr.rel (!%p25_p2) target bundleno = 12 (0xc), region = 125 }
 0x336   : > { %s1389_s20 = smov %s1384_s6 }
 0x338   :  { %609 = vsyncpa [#allocation3], 1 }
 0x339   :  { %611 = vsyncpa [#allocation3 + $0x1], 1 }
 0x33a   :  { %612 = vsyncpa [#allocation6], 1 }
 0x33b   :  { %614 = vsyncpa [#allocation6 + $0x1], 1 }
 0x33c   :  { %615 = vsyncpa [#allocation4], 1 }
 0x33d   :  { %617 = vsyncpa [#allocation4 + $0x1], 1 }
 0x33e   :  { %618 = vsyncpa [#allocation10], 1 }
 0x33f   :  { %620 = vsyncpa [#allocation10 + $0x1], 1 }

</bundles_post_ra>
